<compile_context>
chip_gen: v6e
topology: v6e:2x2x1
jax: 0.10.0
libtpu: 0.0.40
codegen_flags: <defaults>
</compile_context>

<pallas_src>
import functools

import jax
import jax.numpy as jnp
from jax.experimental import pallas as pl
from jax.experimental.pallas import tpu as pltpu


def _gather_einsum_kernel(ind_ref, x_ref, w_ref, out_ref, *, E, K):
    # ind_ref: (1, E*K, 1) int32   x_ref: (1, T, I) f32
    # w_ref:   (E, I, Jp)  f32     out_ref: (1, E, K, Jp) f32
    T = x_ref.shape[1]
    EK = ind_ref.shape[1]

    ind = ind_ref[0]                                           # (E*K, 1)
    iota_t = jax.lax.broadcasted_iota(jnp.int32, (EK, T), 1)   # (E*K, T)
    # One-hot gather matrix; 0/1 are exact in bf16.
    onehot = (iota_t == ind).astype(jnp.bfloat16)              # (E*K, T)

    x = x_ref[0].astype(jnp.bfloat16)                          # (T, I)
    # Row gather as one MXU matmul with f32 accumulation: (E*K, T) @ (T, I).
    gathered = jnp.dot(onehot, x, preferred_element_type=jnp.float32)  # (E*K, I)

    g = gathered.reshape(E, K, -1).astype(jnp.bfloat16)        # (E, K, I)
    w = w_ref[...].astype(jnp.bfloat16)                        # (E, I, Jp)
    # Per-expert einsum as one batched MXU matmul, f32 accumulation.
    y = jnp.einsum("eki,eij->ekj", g, w, preferred_element_type=jnp.float32)
    out_ref[0] = y.astype(out_ref.dtype)                       # (E, K, Jp)


def fused_gather_einsum(X, ind, W):
    """Pallas forward of TorchFusedReshapedEmbeddingGatherEinsum.

    X:   (B, T, I) float32
    ind: (B, E, K) int, values in [0, T)
    W:   (E, I, J) float32
    Returns (B, E, K, J) float32.
    """
    B, T, I = X.shape
    _, E, K = ind.shape
    assert W.shape[0] == E and W.shape[1] == I
    J = W.shape[2]

    # Lane-dense output: pad J up to a multiple of 128 (sliced off below).
    Jp = 128 * pl.cdiv(J, 128)
    W_p = W if Jp == J else jnp.pad(W, ((0, 0), (0, 0), (0, Jp - J)))

    # Per-batch flattened indices (replaces the arange(B)*T offset trick).
    ind_flat = ind.astype(jnp.int32).reshape(B, E * K, 1)

    kernel = functools.partial(_gather_einsum_kernel, E=E, K=K)

    grid_spec = pltpu.PrefetchScalarGridSpec(
        num_scalar_prefetch=0,
        grid=(B,),
        in_specs=[
            pl.BlockSpec((1, E * K, 1), lambda b: (b, 0, 0)),  # ind: per batch
            pl.BlockSpec((1, T, I), lambda b: (b, 0, 0)),      # X:   per batch
            pl.BlockSpec((E, I, Jp), lambda b: (0, 0, 0)),     # W:   resident
        ],
        out_specs=pl.BlockSpec((1, E, K, Jp), lambda b: (b, 0, 0, 0)),
    )

    out = pl.pallas_call(
        kernel,
        out_shape=jax.ShapeDtypeStruct((B, E, K, Jp), jnp.float32),
        grid_spec=grid_spec,
        compiler_params=pltpu.CompilerParams(
            dimension_semantics=("parallel",),
            vmem_limit_bytes=64 * 1024 * 1024,
        ),
    )(ind_flat, X, W_p)

    return out[..., :J] if Jp != J else out


if __name__ == "__main__":
    # Small deterministic shapes consistent with the module's forward.
    B, T, I, J, E, K = 2, 16, 32, 32, 4, 8

    key = jax.random.PRNGKey(0)
    k_w, k_x, k_i = jax.random.split(key, 3)

    W = jax.random.uniform(k_w, (E, I, J), dtype=jnp.float32)   # torch.rand equivalent
    X = jax.random.uniform(k_x, (B, T, I), dtype=jnp.float32)
    ind = jax.random.randint(k_i, (B, E, K), 0, T, dtype=jnp.int32)

    out = fused_gather_einsum(X, ind, W)
    out = jax.block_until_ready(out)

    # Pure-JAX f32 reference: offset + flat embedding == per-batch row gather.
    gathered_ref = X[jnp.arange(B)[:, None, None], ind]          # (B, E, K, I)
    ref = jnp.einsum("beki,eij->bekj", gathered_ref, W)

    assert out.shape == (B, E, K, J)
    # bf16 MXU inputs with f32 accumulation -> compare at bf16-level tolerance.
    assert jnp.allclose(out, ref, rtol=2e-2, atol=2e-2)
    print("KERNEL_OK")
</pallas_src>

<mosaic_0001>
module attributes {stable_mosaic.version = 11 : i64} {
  func.func @_gather_einsum_kernel(%arg0: i32, %arg1: memref<1x32x1xi32, #tpu.memory_space<vmem>>, %arg2: memref<1x16x32xf32, #tpu.memory_space<vmem>>, %arg3: memref<4x32x128xf32, #tpu.memory_space<vmem>>, %arg4: memref<1x4x8x128xf32, #tpu.memory_space<vmem>>) attributes {dimension_semantics = [#tpu.dimension_semantics<parallel>], iteration_bounds = array<i64: 2>, scalar_prefetch = 0 : i64, scratch_operands = 0 : i64, tpu.core_type = #tpu.core_type<tc>, window_params = [{transform_indices = @transform_0, window_bounds = array<i64: 1, 32, 1>}, {transform_indices = @transform_1, window_bounds = array<i64: 1, 16, 32>}, {pipeline_mode = #tpu.pipeline_mode<synchronous>, transform_indices = @transform_2, window_bounds = array<i64: 4, 32, 128>}, {transform_indices = @transform_3, window_bounds = array<i64: 1, 4, 8, 128>}]} {
    %c0 = arith.constant 0 : index
    %c0_0 = arith.constant 0 : index
    %c0_1 = arith.constant 0 : index
    %0 = vector.load %arg1[%c0, %c0_0, %c0_1] : memref<1x32x1xi32, #tpu.memory_space<vmem>>, vector<1x32x1xi32>
    %1 = vector.shape_cast %0 : vector<1x32x1xi32> to vector<32x1xi32>
    %2 = tpu.iota {dimensions = array<i32: 1>} : vector<32x16xi32>
    %3 = vector.broadcast %1 : vector<32x1xi32> to vector<32x16xi32>
    %4 = arith.cmpi eq, %2, %3 : vector<32x16xi32>
    %5 = arith.extui %4 : vector<32x16xi1> to vector<32x16xi32>
    %6 = arith.sitofp %5 : vector<32x16xi32> to vector<32x16xf32>
    %7 = arith.truncf %6 : vector<32x16xf32> to vector<32x16xbf16>
    %c0_2 = arith.constant 0 : index
    %c0_3 = arith.constant 0 : index
    %c0_4 = arith.constant 0 : index
    %8 = vector.load %arg2[%c0_2, %c0_3, %c0_4] : memref<1x16x32xf32, #tpu.memory_space<vmem>>, vector<1x16x32xf32>
    %9 = vector.shape_cast %8 : vector<1x16x32xf32> to vector<16x32xf32>
    %10 = arith.truncf %9 : vector<16x32xf32> to vector<16x32xbf16>
    %cst = arith.constant dense<0.000000e+00> : vector<32x32xf32>
    %11 = tpu.matmul %7, %10, %cst {dimension_numbers = #tpu.dot_dimension_numbers<[1], [0], [0], [1], [0, 0, 1, 1], [], []>} : vector<32x16xbf16>, vector<16x32xbf16>, vector<32x32xf32> -> vector<32x32xf32>
    %12 = vector.shape_cast %11 : vector<32x32xf32> to vector<4x8x32xf32>
    %13 = arith.truncf %12 : vector<4x8x32xf32> to vector<4x8x32xbf16>
    %c0_5 = arith.constant 0 : index
    %c0_6 = arith.constant 0 : index
    %c0_7 = arith.constant 0 : index
    %14 = vector.load %arg3[%c0_5, %c0_6, %c0_7] : memref<4x32x128xf32, #tpu.memory_space<vmem>>, vector<4x32x128xf32>
    %15 = arith.truncf %14 : vector<4x32x128xf32> to vector<4x32x128xbf16>
    "tpu.trace_start"() <{level = 10 : i32, message = "eki,eij->ekj"}> : () -> ()
    %cst_8 = arith.constant dense<0.000000e+00> : vector<4x8x128xf32>
    %16 = tpu.matmul %13, %15, %cst_8 {dimension_numbers = #tpu.dot_dimension_numbers<[2], [1], [1], [2], [0, 0, 0, 1, 1, 2], [0], [0]>} : vector<4x8x32xbf16>, vector<4x32x128xbf16>, vector<4x8x128xf32> -> vector<4x8x128xf32>
    "tpu.trace_stop"() : () -> ()
    %c0_9 = arith.constant 0 : index
    %c0_10 = arith.constant 0 : index
    %c0_11 = arith.constant 0 : index
    %c0_12 = arith.constant 0 : index
    %17 = vector.load %arg4[%c0_9, %c0_10, %c0_11, %c0_12] : memref<1x4x8x128xf32, #tpu.memory_space<vmem>>, vector<1x4x8x128xf32>
    %18 = vector.shape_cast %17 : vector<1x4x8x128xf32> to vector<4x8x128xf32>
    %19 = vector.shape_cast %16 : vector<4x8x128xf32> to vector<1x4x8x128xf32>
    tpu.vector_store %arg4[%c0_9, %c0_10, %c0_11, %c0_12], %19 {strides = array<i32>} : memref<1x4x8x128xf32, #tpu.memory_space<vmem>>, vector<1x4x8x128xf32>,
    return
  }
  func.func @transform_0(%arg0: i32) -> (i32, i32, i32) {
    %c0_i32 = arith.constant 0 : i32
    %c0_i32_0 = arith.constant 0 : i32
    %c0_i32_1 = arith.constant 0 : i32
    return %arg0, %c0_i32, %c0_i32_0 : i32, i32, i32
  }
  func.func @transform_1(%arg0: i32) -> (i32, i32, i32) {
    %c0_i32 = arith.constant 0 : i32
    %c0_i32_0 = arith.constant 0 : i32
    %c0_i32_1 = arith.constant 0 : i32
    return %arg0, %c0_i32, %c0_i32_0 : i32, i32, i32
  }
  func.func @transform_2(%arg0: i32) -> (i32, i32, i32) {
    %c0_i32 = arith.constant 0 : i32
    %c0_i32_0 = arith.constant 0 : i32
    %c0_i32_1 = arith.constant 0 : i32
    %c0_i32_2 = arith.constant 0 : i32
    return %c0_i32, %c0_i32_0, %c0_i32_1 : i32, i32, i32
  }
  func.func @transform_3(%arg0: i32) -> (i32, i32, i32, i32) {
    %c0_i32 = arith.constant 0 : i32
    %c0_i32_0 = arith.constant 0 : i32
    %c0_i32_1 = arith.constant 0 : i32
    %c0_i32_2 = arith.constant 0 : i32
    return %arg0, %c0_i32, %c0_i32_0, %c0_i32_1 : i32, i32, i32, i32
  }
}

</mosaic_0001>

<bundles_post_ra>
// kernel: tpu_custom_call.1
= control target key start
LH: loop header
LB: loop body
LE: loop exit
PB: predicated region body
PF: predicated region fallthrough
CT: control target
= control target key end

     0   :  { %8 = vsyncpa [#allocation3], 0  ;;  %s1010_s0 = inlined_call_operand.vmem [shape: s32[2,32,1], index: 0, kind: input, shape index: {}]   ;;  %s1011_s1 = inlined_call_operand.vmem [shape: f32[2,16,32], index: 1, kind: input, shape index: {}]   ;;  %s1012_s2 = inlined_call_operand.hbm [shape: f32[4,32,128], index: 2, kind: input, shape index: {}]   ;;  %s1013_s3 = inlined_call_operand.hbm [shape: f32[2,4,8,128], index: 3, kind: output, shape index: {}]  }
   0x1   :  { %9 = vsyncpa [#allocation4], 0 }
   0x2   :  { %11 = vsyncpa [#allocation4 + $0x1], 0  ;;  %s863_s12 = smov 0   ;;  %s865_s13 = smov 0  }
   0x3   :  { %s867_s14 = smov 0   ;;  %s869_s15 = smov 0  }
   0x4 LB: > { %s884_s16 = sadd.s32 4294967295, %s832_s15   ;;  %s601_s17 = sadd.s32 4294967294, %s832_s15   ;;  %s832_s15 = sphi %s869_s15, %s1021_s15   ;;  %s828_s14 = sphi %s867_s14, %s1020_s14   ;;  %s824_s13 = sphi %s865_s13, %s1019_s13   ;;  %s820_s12 = sphi %s863_s12, %s1018_s12  }
   0x5   : > { %s888_s18 = sadd.s32 1, %s832_s15   ;;  %s97_s19 = sadd.s32 1, %s828_s14 }
   0x6   : > { %s94_s20 = ssub.s32 %s832_s15, %s888_s18  ;;  %p107_p0 = scmp.ne.s32.totalorder %s828_s14, %s824_s13 }
   0x7   : > { %p95_p1 = scmp.eq.s32.totalorder %s94_s20, 0  ;;  %p108_p2 = scmp.eq.s32.totalorder %s884_s16, 1 }
   0x8   : > { %p113_p3 = scmp.ne.s32.totalorder %s824_s13, %s820_s12  ;;  %p114_p4 = scmp.eq.s32.totalorder %s601_s17, 1 }
   0x9   : > { %s899_s21 = scalar_select %p95_p1, %s828_s14, %s97_s19  }
   0xa   : > { %p901_p5 = por %p108_p2, %p107_p0  ;;  %p905_p6 = por %p114_p4, %p113_p3 }
   0xb   : > { %p602_p7 = scmp.ge.s32.totalorder %s832_s15, 1  ;;  %p121_p8 = scmp.lt.s32.totalorder %s832_s15, 3 }
   0xc   : > { %s1015_s23 = scalar_select %p905_p6, 1, 0 }
   0xd   : > { %p697_p9 = scmp.eq.s32.totalorder %s884_s16, 0  ;;  %p912_p10 = pnand %p602_p7, %p121_p8 }
   0xe   : > { %s834_s25 = smov [#allocation2]  }
   0xf   : > { %s133_s26 = sshll.u32 %s834_s25, 4  ;;  %p689_p11 = pneg %p912_p10  ;;  %s134_s26 = int_to_ptr.vmem [resolvable:$true] %s133_s26 }
  0x10   : > { %s753_s27 = scalar_lea.vmem %s134_s26, 2048  ;;  %p761_p3 = scmp.lt.s32.totalorder %s134_s26, %s134_s26 }
  0x11   : > { %p690_p12 = pnand %p697_p9, %p689_p11  ;;  %p754_p0 = scmp.ne.s32.totalorder %s134_s26, %s753_s27 }
  0x12   : > { %p762_p4 = scmp.lt.s32.totalorder %s753_s27, %s753_s27 }
  0x13   : > { %p744_p13 = pneg %p690_p12 }
  0x14   : > { %p763_p6 = por %p762_p4, %p761_p3 }
  0x15   : > { %p756_p1 = pnand %p754_p0, %p744_p13 }
  0x17   : > { %p757_p2 = pneg %p756_p1 }
  0x19   : > { %p764_p7 = pnand %p763_p6, %p757_p2 }
  0x1b   : > { %767 = shalt.err (!%p764_p7)
}
  0x1c   : > { %s835_s28 = smov 128   ;;  %s836_s29 = smov 8  }
  0x1d   : > { %692 = dma.hbm_to_vmem [thread:$0]  (!%p690_p12), %s1012_s2, 2048, %s134_s26, [#allocation3], %s835_s28, %s835_s28, %s836_s29  }
  0x1e   : > { %165 = sbr.rel (%p912_p10) target bundleno = 594 (0x252), region = 32 }
  0x23   : > { %811 = dma.done.wait (%p697_p9), [#allocation3], 2048  }
  0x24   : > { %813 = vsyncadd (%p697_p9), [#allocation3], 4294965248  ;;  %p194_p8 = scmp.lt.s32.totalorder %s884_s16, 1  ;;  %v837_v0 = vmov 0   ;;  %v838_v1 = vmov 0.0   ;;  %v302_v9 = vld [vmem:[#allocation2 + $0x10] sm:$0xff]  ;;  %v209_v12 = vlaneseq }
  0x25   : > { %741 = vset.pattern.permute.xlu1 %v837_v0  ;;  %740 = vset.pattern.permute.xlu0 %v837_v0  ;;  %v303_v10 = vld [vmem:[#allocation2 + $0x18] sm:$0xff]  ;;  %vm240_vm4 = vcmask 130048   ;;  %v306_v24 = vld [vmem:[#allocation2 + $0x30] sm:$0xff]  ;;  %v300_v26 = vld [vmem:[#allocation2] sm:$0xff]  ;;  %vm839_vm5 = vmmov 0   ;;  %vm324_vm6 = vcmask 261120  }
  0x26   : > { %s195_s5 = scalar_select %p194_p8, %s884_s16, 1  ;;  %651 = vmatprep.subr.bf16.mxu1 %v838_v1  ;;  %v317_v11 = vpack.c.bf16 %v303_v10, %v302_v9  ;;  %v210_v13 = vand.u32 127, %v209_v12  ;;  %v307_v25 = vld [vmem:[#allocation2 + $0x38] sm:$0xff]  ;;  %v301_v28 = vld [vmem:[#allocation2 + $0x8] sm:$0xff]  ;;  %v304_v30 = vld [vmem:[#allocation2 + $0x20] sm:$0xff]  ;;  %655 = vmatprep.mubr.msk.bf16.mxu1 %vm839_vm5, %v838_v1 }
  0x27   : > { %v319_v27 = vpack.c.bf16 %v307_v25, %v306_v24  ;;  %v316_v29 = vpack.c.bf16 %v301_v28, %v300_v26  ;;  %v305_v31 = vld [vmem:[#allocation2 + $0x28] sm:$0xff]  ;;  %v310_v33 = vld [vmem:[#allocation2 + $0x50] sm:$0xff]  ;;  %v311_v34 = vld [vmem:[#allocation2 + $0x58] sm:$0xff]  ;;  %s191_s20 = sand.u32 1, %s824_s13   ;;  %s629_s27 = sshll.u32 %s884_s16, 9 }
  0x28   : > { %s627_s6 = sshll.u32 %s195_s5, 5  ;;  %s628_s7 = sshll.u32 %s195_s5, 4  ;;  %652 = vmatpush3.bf16.msra.mxu1 %v317_v11  ;;  %v318_v32 = vpack.c.bf16 %v305_v31, %v304_v30  ;;  %v321_v37 = vpack.c.bf16 %v311_v34, %v310_v33  ;;  %v314_v38 = vld [vmem:[#allocation2 + $0x70] sm:$0xff]  ;;  %v315_v40 = vld [vmem:[#allocation2 + $0x78] sm:$0xff]  ;;  %v308_v41 = vld [vmem:[#allocation2 + $0x40] sm:$0xff] }
  0x29   : > { %s198_s10 = scalar_lea.vmem %s1010_s0, %s627_s6  ;;  %s203_s19 = scalar_lea.vmem %s1011_s1, %s628_s7  ;;  %653 = vmatprep.subr.bf16.mxu1 %v838_v1  ;;  %v309_v42 = vld [vmem:[#allocation2 + $0x48] sm:$0xff]  ;;  %v323_v45 = vpack.c.bf16 %v315_v40, %v314_v38  ;;  %v312_v48 = vld [vmem:[#allocation2 + $0x60] sm:$0xff] }
  0x2a   : > { %v207_v2 = vld [vmem:[%s198_s10 + $0x10] sm:$0xff]  ;;  %v205_v3 = vld [vmem:[%s198_s10] sm:$0xff]  ;;  %v238_v5 = vld [vmem:[%s203_s19 + $0x8] sm:$0xff]  ;;  %v320_v46 = vpack.c.bf16 %v309_v42, %v308_v41  ;;  %s607_s24 = sshll.u32 %s191_s20, 5  ;;  %s968_s30 = scalar_lea.hbm %s1013_s3, %s629_s27 }
  0x2b   : > { %218 = vperm.xlu1 %741, %v207_v2   ;;  %212 = vperm.xlu0 %740, %v205_v3   ;;  %v237_v4 = vld [vmem:[%s203_s19] sm:$0xff]  ;;  %v208_v6 = vld [vmem:[%s198_s10 + $0x18] sm:$0xff]  ;;  %v206_v7 = vld [vmem:[%s198_s10 + $0x8] sm:$0xff]  ;;  %s193_s25 = scalar_lea.vmem [#allocation5], %s607_s24  ;;  %s970_s16 = scalar_lea.sflag [#allocation4], %s191_s20 }
  0x2c   : > { %v239_v8 = vpack.c.bf16 %v238_v5, %v237_v4  ;;  %654 = vmatpush3.bf16.msra.mxu1 %v316_v29  ;;  %v313_v49 = vld [vmem:[#allocation2 + $0x68] sm:$0xff]  ;;  %s515_s26 = sshll.u32 %s193_s25, 4  ;;  %s840_s5 = smov [#allocation5]   ;;  %s963_s26 = int_to_ptr.vmem [resolvable:$true] %s515_s26 }
  0x2d   : > { %667 = vmatprep.subr.bf16.mxu1 %v838_v1  ;;  %v322_v50 = vpack.c.bf16 %v313_v49, %v312_v48  ;;  %s768_s4 = scalar_lea.vmem %s963_s26, 512  ;;  %s772_s6 = sshll.u32 %s840_s5, 4  ;;  %s773_s6 = int_to_ptr.vmem [resolvable:$false] %s772_s6 }
  0x2e   : > { %645 = vmatprep.subr.bf16.mxu0 %v239_v8  ;;  %p769_p6 = scmp.ne.s32.totalorder %s963_s26, %s768_s4  ;;  %s774_s7 = scalar_lea.vmem %s773_s6, 1024 }
  0x2f   : > { %221 = vperm.xlu1 %741, %v208_v6   ;;  %215 = vperm.xlu0 %740, %v206_v7   ;;  %p775_p11 = scmp.lt.s32.totalorder %s963_s26, %s773_s6  ;;  %p776_p12 = scmp.lt.s32.totalorder %s774_s7, %s768_s4 }
  0x30   : > { %646 = vmatpush3.bf16.msra.mxu0 %v239_v8  ;;  %p770_p9 = pnand %p769_p6, %p901_p5 }
  0x31   : > { %659 = vmatprep.subr.bf16.mxu0 %v838_v1  ;;  %p777_p13 = por %p776_p12, %p775_p11 }
  0x32   : > { %p771_p10 = pneg %p770_p9 }
  0x34   : > { %p778_p0 = pnand %p777_p13, %p771_p10 }
  0xa6   : > { %v219_v14 = vpop.permute.xlu1 %218  ;;  %v213_v15 = vpop.permute.xlu0 %212 }
  0xa7   : > { %vm225_vm0 = vcmp.eq.s32.totalorder %v210_v13, %v219_v14  ;;  %vm223_vm1 = vcmp.eq.s32.totalorder %v210_v13, %v213_v15 }
  0xa8   : > { %v614_v18 = vsel %vm225_vm0, 1.0, %v838_v1  ;;  %v612_v19 = vsel %vm223_vm1, 1.0, %v838_v1 }
  0xaa   : > { %v222_v16 = vpop.permute.xlu1 %221  ;;  %v216_v17 = vpop.permute.xlu0 %215 }
  0xab   : > { %vm226_vm2 = vcmp.eq.s32.totalorder %v210_v13, %v222_v16  ;;  %vm224_vm3 = vcmp.eq.s32.totalorder %v210_v13, %v216_v17 }
  0xac   : > { %v615_v20 = vsel %vm226_vm2, 1.0, %v838_v1  ;;  %v613_v21 = vsel %vm224_vm3, 1.0, %v838_v1 }
  0xad   : > { %v236_v22 = vpack.c.bf16 %v615_v20, %v614_v18  ;;  %v235_v23 = vpack.c.bf16 %v613_v21, %v612_v19 }
  0xaf   : > { %647 = vmatprep.mubr.msk.bf16.mxu0 %vm240_vm4, %v235_v23 }
  0xb0   : > { %648 = vmatmul.mubr.msk.bf16.vlgmr.msra.gmra.mxu0 %vm240_vm4, %v236_v22 }
  0xb1   : > { %660 = vmatpush3.bf16.msra.mxu0 %v319_v27  ;;  %663 = vmatprep.mubr.msk.bf16.mxu0 %vm839_vm5, %v838_v1 }
  0xb2   : > { %661 = vmatprep.subr.bf16.mxu0 %v838_v1 }
  0xb5   : > { %662 = vmatpush3.bf16.msra.mxu0 %v318_v32 }
  0xb6   : > { %675 = vmatprep.subr.bf16.mxu0 %v838_v1 }
 0x170   : > { %v649_v35 = vpop.f32.mrf.mxu0 }
 0x171   : > { %v298_v51 = vpack.c.bf16 %v649_v35, %v649_v35 }
 0x172   : > { %v281_v36 = vpop.f32.mrf.mxu0 }
 0x173   : > { %v296_v39 = vpack.c.bf16 %v281_v36, %v281_v36 }
 0x174   : > { %v650_v43 = vpop.f32.mrf.mxu0 }
 0x175   : > { %656 = vmatmul.mubr.msk.bf16.vlgmr.msra.gmra.mxu1 %vm324_vm6, %v296_v39  ;;  %v299_v52 = vpack.c.bf16 %v650_v43, %v650_v43 }
 0x176   : > { %v284_v44 = vpop.f32.mrf.mxu0  ;;  %668 = vmatpush3.bf16.msra.mxu1 %v321_v37  ;;  %671 = vmatprep.mubr.msk.bf16.mxu1 %vm839_vm5, %v838_v1 }
 0x177   : > { %v297_v47 = vpack.c.bf16 %v284_v44, %v284_v44  ;;  %669 = vmatprep.subr.bf16.mxu1 %v838_v1 }
 0x179   : > { %664 = vmatmul.mubr.msk.bf16.vlgmr.msra.gmra.mxu0 %vm324_vm6, %v297_v47 }
 0x17a   : > { %676 = vmatpush3.bf16.msra.mxu0 %v323_v45  ;;  %670 = vmatpush3.bf16.msra.mxu1 %v320_v46 }
 0x17b   : > { %677 = vmatprep.subr.bf16.mxu0 %v838_v1  ;;  %679 = vmatprep.mubr.msk.bf16.mxu0 %vm839_vm5, %v838_v1 }
 0x17d   : > { %672 = vmatmul.mubr.msk.bf16.vlgmr.msra.gmra.mxu1 %vm324_vm6, %v298_v51 }
 0x17e   : > { %678 = vmatpush3.bf16.msra.mxu0 %v322_v50 }
 0x181   : > { %680 = vmatmul.mubr.msk.bf16.vlgmr.msra.gmra.mxu0 %vm324_vm6, %v299_v52 }
 0x235   : > { %v362_v53 = vpop.f32.mrf.mxu1 }
 0x236   : > { %497 = vst [vmem:[%s193_s25] sm:$0xff] %v362_v53 }
 0x237   : > { %v657_v54 = vpop.f32.mrf.mxu1 }
 0x239   : > { %v365_v55 = vpop.f32.mrf.mxu1  ;;  %v405_v56 = vpop.f32.mrf.mxu0 }
 0x23a   : > { %498 = vst [vmem:[%s193_s25 + $0x8] sm:$0xff] %v405_v56 }
 0x23b   : > { %v658_v57 = vpop.f32.mrf.mxu1  ;;  %v665_v58 = vpop.f32.mrf.mxu0 }
 0x23d   : > { %v408_v59 = vpop.f32.mrf.mxu0  ;;  %v448_v60 = vpop.f32.mrf.mxu1 }
 0x23e   : > { %499 = vst [vmem:[%s193_s25 + $0x10] sm:$0xff] %v448_v60 }
 0x23f   : > { %v666_v61 = vpop.f32.mrf.mxu0  ;;  %v673_v62 = vpop.f32.mrf.mxu1 }
 0x241   : > { %v451_v63 = vpop.f32.mrf.mxu1  ;;  %v491_v0 = vpop.f32.mrf.mxu0 }
 0x242   : > { %500 = vst [vmem:[%s193_s25 + $0x18] sm:$0xff] %v491_v0 }
 0x243   : > { %v674_v1 = vpop.f32.mrf.mxu1  ;;  %v681_v2 = vpop.f32.mrf.mxu0 }
 0x244   : > { %781 = shalt.err (!%p778_p0)
}
 0x245   : > { %s782_s8 = scalar_lea.hbm %s968_s30, 512  ;;  %s786_s11 = scalar_lea.hbm %s1013_s3, 1024 }
 0x246   : > { %p783_p1 = scmp.ne.s32.totalorder %s968_s30, %s782_s8  ;;  %p787_p4 = scmp.lt.s32.totalorder %s968_s30, %s1013_s3 }
 0x247   : > { %p788_p7 = scmp.lt.s32.totalorder %s786_s11, %s782_s8 }
 0x248   : > { %p784_p2 = pnand %p783_p1, %p901_p5 }
 0x249   : > { %p789_p8 = por %p788_p7, %p787_p4 }
 0x24a   : > { %p785_p3 = pneg %p784_p2 }
 0x24c   : > { %p790_p6 = pnand %p789_p8, %p785_p3 }
 0x24e   : > { %793 = shalt.err (!%p790_p6)
}
 0x24f   : > { %s841_s20 = smov 128   ;;  %s842_s24 = smov 8   ;;  %v494_v3 = vpop.f32.mrf.mxu0 }
 0x250   : > { %687 = dma.vmem_to_hbm [thread:$0]  (%p901_p5), %s963_s26, 512, %s968_s30, %s970_s16, %s841_s20, %s841_s20, %s842_s24  }
 0x251   : > { %v682_v4 = vpop.f32.mrf.mxu0 }
 0x252 PF: > { %p699_p9 = scmp.ge.s32.totalorder %s832_s15, 2  ;;  %s530_s25 = sand.u32 1, %s820_s12  }
 0x253   : > { %p1017_p10 = scmp.ne.s32.totalorder %s1015_s23, 0  ;;  %s531_s27 = scalar_lea.sflag [#allocation4], %s530_s25 }
 0x255   : > { %p694_p11 = pnand %p699_p9, %p1017_p10 }
 0x257   : > { %p695_p12 = pneg %p694_p11 }
 0x259   : > { %815 = dma.done.wait (%p695_p12), %s531_s27, 512  }
 0x25a   : > { %817 = vsyncadd (%p695_p12), %s531_s27, 4294966784  ;;  %p14_p5 = scmp.ge.s32.totalorder %s888_s18, 4   ;;  %s1018_s12 = smov %s824_s13 }
 0x25b   : > { %s1019_s13 = smov %s828_s14  ;;  %s1020_s14 = smov %s899_s21 }
 0x25c   : > { %s1021_s15 = smov %s888_s18  ;;  %16 = sbr.rel (!%p14_p5) target bundleno = 4 (0x4), region = 75 }
 0x261   :  { %536 = vsyncpa [#allocation3], 1 }
 0x262   :  { %538 = vsyncpa [#allocation3 + $0x1], 1 }
 0x263   :  { %539 = vsyncpa [#allocation4], 1 }
 0x264   :  { %541 = vsyncpa [#allocation4 + $0x1], 1 }

</bundles_post_ra>
